<compile_context>
chip_gen: v7x
topology: tpu7x:2x2x1
jax: 0.10.0
libtpu: 0.0.40
codegen_flags: <defaults>
</compile_context>

<pallas_src>
import functools

import jax
import jax.numpy as jnp
from jax.experimental import pallas as pl
from jax.experimental.pallas import tpu as pltpu


def _pad_kernel(x_ref, o_ref, *, p, h, w):
    # x_ref: (B, h, w)    batch of (n, c) images
    # o_ref: (B, hp, wp)  padded output, hp = h + 2p, wp = w + 2p
    x = x_ref[...]
    # Circular pad along W: [x[..., w-p:], x, x[..., :p]] -> (B, h, wp)
    mid = jnp.concatenate([x[:, :, w - p:], x, x[:, :, :p]], axis=-1)
    # Zero pad along H: memset the whole output block, then store the
    # W-padded rows at sublane offset p (rows [p, p+h)).
    o_ref[...] = jnp.zeros(o_ref.shape, dtype=o_ref.dtype)
    o_ref[:, p:p + h, :] = mid


def _choose_block_batch(nc, bytes_per_img, target_bytes=2 << 20):
    """Largest divisor of nc whose (input + output) block is ~<= target_bytes,
    while keeping >= 2 grid steps (so both v7x TensorCores get work)."""
    b_cap = max(1, target_bytes // max(1, bytes_per_img))
    if nc >= 2:
        b_cap = min(b_cap, max(1, nc // 2))
    b = 1
    for d in range(1, min(nc, b_cap) + 1):
        if nc % d == 0:
            b = d
    return b


def custom_pad2d(x, kern_size, padding_type="Cons"):
    """Pallas TPU implementation of CustomPad2d.forward (NCHW in / NCHW out)."""
    if padding_type != "Cons":
        raise RuntimeError("ERROR - NO Padding style given!!!")
    p = (kern_size - 1) // 2
    if p == 0:
        return x

    n, c, h, w = x.shape
    hp, wp = h + 2 * p, w + 2 * p
    nc = n * c
    x3 = x.reshape(nc, h, w)

    itemsize = jnp.dtype(x.dtype).itemsize
    bytes_per_img = (h * w + hp * wp) * itemsize
    b = _choose_block_batch(nc, bytes_per_img)
    grid = nc // b

    kernel = functools.partial(_pad_kernel, p=p, h=h, w=w)
    out = pl.pallas_call(
        kernel,
        grid=(grid,),
        in_specs=[pl.BlockSpec((b, h, w), lambda i: (i, 0, 0))],
        out_specs=pl.BlockSpec((b, hp, wp), lambda i: (i, 0, 0)),
        out_shape=jax.ShapeDtypeStruct((nc, hp, wp), x.dtype),
        compiler_params=pltpu.CompilerParams(
            dimension_semantics=("parallel",),
        ),
    )(x3)

    # TODO(synk): for maximum HBM savings, fuse this pad into the consuming
    # conv kernel instead of materializing the padded tensor.
    return out.reshape(n, c, hp, wp)


def _reference_pad(x, kern_size):
    p = (kern_size - 1) // 2
    y = jnp.pad(x, ((0, 0), (0, 0), (0, 0), (p, p)), mode="wrap")
    y = jnp.pad(y, ((0, 0), (0, 0), (p, p), (0, 0)), mode="constant")
    return y


if __name__ == "__main__":
    key = jax.random.PRNGKey(0)
    n, c, h, w = 2, 4, 16, 16
    kern_size = 3

    x = jax.random.normal(key, (n, c, h, w), jnp.float32)

    fwd = jax.jit(functools.partial(custom_pad2d, kern_size=kern_size))
    out = fwd(x)
    jax.block_until_ready(out)

    p = (kern_size - 1) // 2
    assert out.shape == (n, c, h + 2 * p, w + 2 * p), out.shape
    assert out.dtype == jnp.float32

    ref = _reference_pad(x, kern_size)
    assert jnp.allclose(out, ref, atol=0.0, rtol=0.0), float(
        jnp.max(jnp.abs(out - ref))
    )

    print("KERNEL_OK")
</pallas_src>

<mosaic_0001>
module attributes {stable_mosaic.version = 11 : i64} {
  func.func @_pad_kernel(%arg0: i32, %arg1: memref<4x16x16xf32, #tpu.memory_space<vmem>>, %arg2: memref<4x18x18xf32, #tpu.memory_space<vmem>>) attributes {dimension_semantics = [#tpu.dimension_semantics<parallel>], iteration_bounds = array<i64: 2>, scalar_prefetch = 0 : i64, scratch_operands = 0 : i64, tpu.core_type = #tpu.core_type<tc>, window_params = [{transform_indices = @transform_0, window_bounds = array<i64: 4, 16, 16>}, {transform_indices = @transform_1, window_bounds = array<i64: 4, 18, 18>}]} {
    %c0 = arith.constant 0 : index
    %c0_0 = arith.constant 0 : index
    %c0_1 = arith.constant 0 : index
    %0 = vector.load %arg1[%c0, %c0_0, %c0_1] : memref<4x16x16xf32, #tpu.memory_space<vmem>>, vector<4x16x16xf32>
    %1 = vector.extract_strided_slice %0 {offsets = [0, 0, 15], sizes = [4, 16, 1], strides = [1, 1, 1]} : vector<4x16x16xf32> to vector<4x16x1xf32>
    %2 = vector.extract_strided_slice %0 {offsets = [0, 0, 0], sizes = [4, 16, 1], strides = [1, 1, 1]} : vector<4x16x16xf32> to vector<4x16x1xf32>
    %3 = tpu.concatenate %1, %0, %2 in 2 : vector<4x16x1xf32>, vector<4x16x16xf32>, vector<4x16x1xf32> -> vector<4x16x18xf32>
    %cst = arith.constant 0.000000e+00 : f32
    %4 = vector.broadcast %cst : f32 to vector<4x18x18xf32>
    %c0_2 = arith.constant 0 : index
    %c0_3 = arith.constant 0 : index
    %c0_4 = arith.constant 0 : index
    %5 = vector.load %arg2[%c0_2, %c0_3, %c0_4] : memref<4x18x18xf32, #tpu.memory_space<vmem>>, vector<4x18x18xf32>
    tpu.vector_store %arg2[%c0_2, %c0_3, %c0_4], %4 {strides = array<i32>} : memref<4x18x18xf32, #tpu.memory_space<vmem>>, vector<4x18x18xf32>,
    %c0_5 = arith.constant 0 : index
    %c1 = arith.constant 1 : index
    %c0_6 = arith.constant 0 : index
    %6 = vector.load %arg2[%c0_5, %c1, %c0_6] : memref<4x18x18xf32, #tpu.memory_space<vmem>>, vector<4x16x18xf32>
    tpu.vector_store %arg2[%c0_5, %c1, %c0_6], %3 {strides = array<i32>} : memref<4x18x18xf32, #tpu.memory_space<vmem>>, vector<4x16x18xf32>,
    return
  }
  func.func @transform_0(%arg0: i32) -> (i32, i32, i32) {
    %c0_i32 = arith.constant 0 : i32
    %c0_i32_0 = arith.constant 0 : i32
    %c0_i32_1 = arith.constant 0 : i32
    return %arg0, %c0_i32, %c0_i32_0 : i32, i32, i32
  }
  func.func @transform_1(%arg0: i32) -> (i32, i32, i32) {
    %c0_i32 = arith.constant 0 : i32
    %c0_i32_0 = arith.constant 0 : i32
    %c0_i32_1 = arith.constant 0 : i32
    return %arg0, %c0_i32, %c0_i32_0 : i32, i32, i32
  }
}

</mosaic_0001>

<bundles_post_ra>
// kernel: custom_pad2d.1
= control target key start
LH: loop header
LB: loop body
LE: loop exit
PB: predicated region body
PF: predicated region fallthrough
CT: control target
= control target key end

     0   :  { %6 = vsyncpa [#allocation3], 0  ;;  %s671_s0 = inlined_call_operand.hbm [shape: f32[8,16,16], index: 0, kind: input, shape index: {}]   ;;  %s672_s1 = inlined_call_operand.vmem [shape: f32[8,18,18], index: 1, kind: output, shape index: {}]  }
   0x1   :  { %8 = vsyncpa [#allocation3 + $0x1], 0  ;;  %s484_s6 = smov 0   ;;  %s486_s7 = smov 0  }
   0x2   :  { %s488_s8 = smov 0   ;;  %s490_s9 = smov 0  }
   0x3 LB: > { %s339_s10 = sadd.s32 4294967295, %s465_s9   ;;  %s504_s11 = sadd.s32 1, %s465_s9   ;;  %s465_s9 = sphi %s490_s9, %s679_s9   ;;  %s461_s8 = sphi %s488_s8, %s678_s8   ;;  %s457_s7 = sphi %s486_s7, %s677_s7   ;;  %s453_s6 = sphi %s484_s6, %s676_s6  }
   0x4   : > { %s18_s12 = ssub.s32 %s465_s9, %s504_s11  ;;  %s21_s13 = sadd.s32 1, %s461_s8 }
   0x5   : > { %p19_p0 = scmp.eq.s32.totalorder %s18_s12, 0  ;;  %p28_p1 = scmp.ne.s32.totalorder %s461_s8, %s457_s7 }
   0x6   : > { %p29_p2 = scmp.eq.s32.totalorder %s465_s9, 0  ;;  %p34_p3 = scmp.ne.s32.totalorder %s457_s7, %s453_s6 }
   0x7   : > { %s514_s14 = scalar_select %p19_p0, %s461_s8, %s21_s13  }
   0x8   : > { %p30_p4 = por %p29_p2, %p28_p1  ;;  %p35_p5 = scmp.eq.s32.totalorder %s339_s10, 0 }
   0x9   : > { %p362_p6 = scmp.lt.s32.totalorder %s465_s9, 2  ;;  %s84_s16 = sand.u32 1, %s461_s8  }
   0xa   : > { %p519_p7 = por %p35_p5, %p34_p3  ;;  %s343_s17 = sshll.u32 %s84_s16, 6 }
   0xb   : > { %s354_s18 = sshll.u32 %s465_s9, 10  ;;  %s88_s22 = scalar_lea.vmem [#allocation2], %s343_s17 }
   0xc   : > { %s528_s21 = scalar_lea.hbm %s671_s0, %s354_s18  ;;  %s96_s23 = sshll.u32 %s88_s22, 4  ;;  %s530_s23 = int_to_ptr.vmem [resolvable:$true] %s96_s23 }
   0xd   : > { %p532_p8 = pnand %p362_p6, %p30_p4  ;;  %s537_s25 = scalar_lea.sflag [#allocation3], %s84_s16 }
   0xe   : > { %s401_s26 = scalar_lea.hbm %s528_s21, 1024  ;;  %s406_s29 = scalar_lea.hbm %s671_s0, 2048 }
   0xf   : > { %p402_p10 = scmp.ne.s32.totalorder %s528_s21, %s401_s26  ;;  %p403_p11 = pneg %p532_p8 }
  0x10   : > { %p407_p0 = scmp.lt.u32.totalorder %s528_s21, %s671_s0  ;;  %p408_p1 = scmp.lt.u32.totalorder %s406_s29, %s401_s26 }
  0x11   : > { %p404_p12 = pnand %p403_p11, %p402_p10  ;;  %p410_p3 = scmp.lt.u32.totalorder %s401_s26, %s528_s21 }
  0x12   : > { %p409_p2 = por %p408_p1, %p407_p0 }
  0x13   : > { %p405_p13 = pneg %p404_p12 }
  0x14   : > { %p411_p4 = por %p410_p3, %p409_p2 }
  0x16   : > { %p412_p5 = pnand %p411_p4, %p405_p13 }
  0x18   : > { %415 = shalt.err (!%p412_p5)
}
  0x19   : > { %s416_s3 = scalar_lea.vmem %s530_s23, 1024  ;;  %s467_s4 = smov [#allocation2]  }
  0x1a   : > { %p417_p6 = scmp.ne.s32.totalorder %s530_s23, %s416_s3  ;;  %s421_s5 = sshll.u32 %s467_s4, 4  ;;  %s422_s5 = int_to_ptr.vmem [resolvable:$false] %s421_s5 }
  0x1b   : > { %s423_s6 = scalar_lea.vmem %s422_s5, 2048  ;;  %p424_p9 = scmp.lt.s32.totalorder %s530_s23, %s422_s5 }
  0x1c   : > { %p419_p10 = pnand %p417_p6, %p403_p11  ;;  %p425_p0 = scmp.lt.s32.totalorder %s423_s6, %s416_s3 }
  0x1e   : > { %p420_p12 = pneg %p419_p10  ;;  %p426_p1 = por %p425_p0, %p424_p9 }
  0x20   : > { %p427_p2 = pnand %p426_p1, %p420_p12 }
  0x22   : > { %430 = shalt.err (!%p427_p2)
}
  0x23   : > { %s468_s12 = smov 128   ;;  %s469_s13 = smov 8  }
  0x24   : > { %361 = dma.hbm_to_vmem [thread:$0]  (!%p532_p8), %s528_s21, 1024, %s530_s23, %s537_s25, %s468_s12, %s468_s12, %s469_s13  }
  0x25   : > { %p104_p11 = scmp.lt.s32.totalorder %s465_s9, 3  ;;  %p675_p13 = scmp.ge.s32.totalorder %s465_s9, 1 }
  0x27   : > { %p105_p3 = pnand %p675_p13, %p104_p11 }
  0x28   : > { %s110_s16 = sand.u32 (!%p105_p3), 1, %s457_s7  }
  0x29   : > { %108 = sbr.rel (%p105_p3) target bundleno = 212 (0xd4), region = 24  ;;  %s348_s17 = sshll.u32 (!%p105_p3), %s110_s16, 6 }
  0x2a   : > { %s111_s18 = scalar_lea.sflag (!%p105_p3), [#allocation3], %s110_s16  ;;  %s569_s19 = scalar_lea.vmem (!%p105_p3), [#allocation2], %s348_s17 }
  0x30   : > { %448 = dma.done.wait (%p519_p7), %s111_s18, 1024  }
  0x31   : > { %450 = vsyncadd (%p519_p7), %s111_s18, 4294966272  ;;  %s349_s20 = sshll.u32 %s339_s10, 2  ;;  %v142_v0 = vld [vmem:[%s569_s19] sm:$0xff]  ;;  %vm248_vm0 = vcmask 146432   ;;  %s470_s22 = smov 1   ;;  %vm251_vm1 = vcmask 140288  }
  0x32   : > { %p136_p8 = scmp.lt.s32.totalorder %s349_s20, 7  ;;  %182 = vrot.lane.b32.xlu1 %v142_v0, %s470_s22  ;;  %s471_s23 = smov 113   ;;  %v143_v1 = vld [vmem:[%s569_s19 + $0x8] sm:$0xff]  ;;  %v472_v2 = vmov 0.0   ;;  %v145_v3 = vld [vmem:[%s569_s19 + $0x18] sm:$0xff]  ;;  %v144_v4 = vld [vmem:[%s569_s19 + $0x10] sm:$0xff] }
  0x33   : > { %158 = vrot.lane.b32.xlu0 %v142_v0, %s471_s23  ;;  %s473_s9 = smov 17   ;;  %v147_v5 = vld [vmem:[%s569_s19 + $0x28] sm:$0xff]  ;;  %v146_v6 = vld [vmem:[%s569_s19 + $0x20] sm:$0xff]  ;;  %v149_v7 = vld [vmem:[%s569_s19 + $0x38] sm:$0xff]  ;;  %vm230_vm2 = vcmask 7168   ;;  %vm239_vm3 = vcmask 138240  }
  0x34   : > { %s681_s20 = smov (!%p136_p8, %s349_s20), 7  ;;  %v148_v8 = vld [vmem:[%s569_s19 + $0x30] sm:$0xff] }
  0x35   : > { %s355_s21 = smul.u32 24, %s681_s20 }
  0x36   : > { %184 = vrot.lane.b32.xlu1 %v143_v1, %s470_s22 }
  0x37   : > { %s583_s15 = scalar_lea.vmem %s672_s1, %s355_s21  ;;  %160 = vrot.lane.b32.xlu0 %v143_v1, %s471_s23 }
  0x38   : > { %250 = vst.msk [vmem:[%s583_s15 + $0x8] sm:$0xff] %vm248_vm0, %v472_v2  ;;  %249 = vst.msk [vmem:[%s583_s15] sm:$0xff] %vm248_vm0, %v472_v2 }
  0x39   : > { %252 = vst.msk [vmem:[%s583_s15 + $0x10] sm:$0x3] %vm251_vm1, %v472_v2  ;;  %255 = vst.msk [vmem:[%s583_s15 + $0x28] sm:$0x3] %vm251_vm1, %v472_v2 }
  0x3a   : > { %254 = vst.msk [vmem:[%s583_s15 + $0x20] sm:$0xff] %vm248_vm0, %v472_v2  ;;  %253 = vst.msk [vmem:[%s583_s15 + $0x18] sm:$0xff] %vm248_vm0, %v472_v2  ;;  %164 = vrot.lane.b32.xlu1 %v145_v3, %s471_s23 }
  0x3b   : > { %257 = vst.msk [vmem:[%s583_s15 + $0x38] sm:$0xff] %vm248_vm0, %v472_v2  ;;  %256 = vst.msk [vmem:[%s583_s15 + $0x30] sm:$0xff] %vm248_vm0, %v472_v2  ;;  %162 = vrot.lane.b32.xlu0 %v144_v4, %s471_s23 }
  0x3c   : > { %258 = vst.msk [vmem:[%s583_s15 + $0x40] sm:$0x3] %vm251_vm1, %v472_v2  ;;  %261 = vst.msk [vmem:[%s583_s15 + $0x58] sm:$0x3] %vm251_vm1, %v472_v2 }
  0x3d   : > { %260 = vst.msk [vmem:[%s583_s15 + $0x50] sm:$0xff] %vm248_vm0, %v472_v2  ;;  %259 = vst.msk [vmem:[%s583_s15 + $0x48] sm:$0xff] %vm248_vm0, %v472_v2 }
  0x3e   : > { %188 = vrot.lane.b32.xlu1 %v145_v3, %s470_s22 }
  0x3f   : > { %186 = vrot.lane.b32.xlu0 %v144_v4, %s470_s22 }
  0x42   : > { %208 = vrot.lane.b32.xlu1 %v143_v1, %s473_s9 }
  0x43   : > { %206 = vrot.lane.b32.xlu0 %v142_v0, %s473_s9 }
  0x46   : > { %168 = vrot.lane.b32.xlu1 %v147_v5, %s471_s23 }
  0x47   : > { %166 = vrot.lane.b32.xlu0 %v146_v6, %s471_s23 }
  0x4a   : > { %192 = vrot.lane.b32.xlu1 %v147_v5, %s470_s22 }
  0x4b   : > { %190 = vrot.lane.b32.xlu0 %v146_v6, %s470_s22 }
  0x4e   : > { %212 = vrot.lane.b32.xlu1 %v145_v3, %s473_s9 }
  0x4f   : > { %210 = vrot.lane.b32.xlu0 %v144_v4, %s473_s9 }
  0x52   : > { %172 = vrot.lane.b32.xlu1 %v149_v7, %s471_s23 }
  0x53   : > { %170 = vrot.lane.b32.xlu0 %v148_v8, %s471_s23 }
  0x56   : > { %196 = vrot.lane.b32.xlu1 %v149_v7, %s470_s22 }
  0x57   : > { %194 = vrot.lane.b32.xlu0 %v148_v8, %s470_s22 }
  0x5a   : > { %216 = vrot.lane.b32.xlu1 %v147_v5, %s473_s9 }
  0x5b   : > { %214 = vrot.lane.b32.xlu0 %v146_v6, %s473_s9 }
  0x5e   : > { %220 = vrot.lane.b32.xlu1 %v149_v7, %s473_s9 }
  0x5f   : > { %218 = vrot.lane.b32.xlu0 %v148_v8, %s473_s9 }
  0xa4   : > { %v183_v9 = vpop.permute.xlu1 %182 }
  0xa5   : > { %v159_v10 = vpop.permute.xlu0 %158 }
  0xa6   : > { %v231_v17 = vsel %vm230_vm2, %v159_v10, %v183_v9 }
  0xa8   : > { %v185_v11 = vpop.permute.xlu1 %184 }
  0xa9   : > { %v161_v12 = vpop.permute.xlu0 %160 }
  0xaa   : > { %v232_v18 = vsel %vm230_vm2, %v161_v12, %v185_v11 }
  0xac   : > { %v165_v13 = vpop.permute.xlu1 %164 }
  0xad   : > { %v163_v14 = vpop.permute.xlu0 %162 }
  0xb0   : > { %v189_v15 = vpop.permute.xlu1 %188 }
  0xb1   : > { %v187_v16 = vpop.permute.xlu0 %186  ;;  %v234_v27 = vsel %vm230_vm2, %v165_v13, %v189_v15 }
  0xb2   : > { %v233_v28 = vsel %vm230_vm2, %v163_v14, %v187_v16 }
  0xb4   : > { %v209_v19 = vpop.permute.xlu1 %208 }
  0xb5   : > { %v207_v20 = vpop.permute.xlu0 %206  ;;  %v241_v21 = vsel %vm239_vm3, %v232_v18, %v209_v19 }
  0xb6   : > { %v240_v22 = vsel %vm239_vm3, %v231_v17, %v207_v20  ;;  %263 = vst.msk [vmem:[%s583_s15 + $0x9] sm:$0xff] %vm248_vm0, %v241_v21 }
  0xb7   : > { %262 = vst.msk [vmem:[%s583_s15 + $0x1] sm:$0xff] %vm248_vm0, %v240_v22 }
  0xb8   : > { %v169_v23 = vpop.permute.xlu1 %168 }
  0xb9   : > { %v167_v24 = vpop.permute.xlu0 %166 }
  0xbc   : > { %v193_v25 = vpop.permute.xlu1 %192 }
  0xbd   : > { %v191_v26 = vpop.permute.xlu0 %190  ;;  %v236_v37 = vsel %vm230_vm2, %v169_v23, %v193_v25 }
  0xbe   : > { %v235_v38 = vsel %vm230_vm2, %v167_v24, %v191_v26 }
  0xc0   : > { %v213_v29 = vpop.permute.xlu1 %212 }
  0xc1   : > { %v211_v30 = vpop.permute.xlu0 %210  ;;  %v243_v31 = vsel %vm239_vm3, %v234_v27, %v213_v29 }
  0xc2   : > { %v242_v32 = vsel %vm239_vm3, %v233_v28, %v211_v30  ;;  %265 = vst.msk [vmem:[%s583_s15 + $0x21] sm:$0xff] %vm248_vm0, %v243_v31 }
  0xc3   : > { %264 = vst.msk [vmem:[%s583_s15 + $0x19] sm:$0xff] %vm248_vm0, %v242_v32 }
  0xc4   : > { %v173_v33 = vpop.permute.xlu1 %172 }
  0xc5   : > { %v171_v34 = vpop.permute.xlu0 %170 }
  0xc8   : > { %v197_v35 = vpop.permute.xlu1 %196 }
  0xc9   : > { %v195_v36 = vpop.permute.xlu0 %194  ;;  %v238_v43 = vsel %vm230_vm2, %v173_v33, %v197_v35 }
  0xca   : > { %v237_v44 = vsel %vm230_vm2, %v171_v34, %v195_v36 }
  0xcc   : > { %v217_v39 = vpop.permute.xlu1 %216 }
  0xcd   : > { %v215_v40 = vpop.permute.xlu0 %214  ;;  %v245_v41 = vsel %vm239_vm3, %v236_v37, %v217_v39 }
  0xce   : > { %v244_v42 = vsel %vm239_vm3, %v235_v38, %v215_v40  ;;  %267 = vst.msk [vmem:[%s583_s15 + $0x39] sm:$0xff] %vm248_vm0, %v245_v41 }
  0xcf   : > { %266 = vst.msk [vmem:[%s583_s15 + $0x31] sm:$0xff] %vm248_vm0, %v244_v42 }
  0xd0   : > { %v221_v45 = vpop.permute.xlu1 %220 }
  0xd1   : > { %v219_v46 = vpop.permute.xlu0 %218  ;;  %v247_v47 = vsel %vm239_vm3, %v238_v43, %v221_v45 }
  0xd2   : > { %v246_v48 = vsel %vm239_vm3, %v237_v44, %v219_v46  ;;  %269 = vst.msk [vmem:[%s583_s15 + $0x51] sm:$0xff] %vm248_vm0, %v247_v47 }
  0xd3   : > { %268 = vst.msk [vmem:[%s583_s15 + $0x49] sm:$0xff] %vm248_vm0, %v246_v48 }
  0xd4 PF: > { %p11_p7 = scmp.ge.s32.totalorder %s504_s11, 4   ;;  %s676_s6 = smov %s457_s7 }
  0xd5   : > { %s677_s7 = smov %s461_s8  ;;  %s678_s8 = smov %s514_s14 }
  0xd6   : > { %s679_s9 = smov %s504_s11  ;;  %13 = sbr.rel (!%p11_p7) target bundleno = 3 (0x3), region = 64 }
  0xdd   :  { %294 = vsyncpa [#allocation3], 1 }
  0xde   :  { %296 = vsyncpa [#allocation3 + $0x1], 1 }

</bundles_post_ra>
